<compile_context>
chip_gen: v5e
topology: v5e:2x2
jax: 0.10.0
libtpu: 0.0.40
codegen_flags: <defaults>
</compile_context>

<pallas_src>
import functools

import jax
import jax.numpy as jnp
from jax.experimental import pallas as pl
from jax.experimental.pallas import tpu as pltpu


def _round_up(x, m):
    return (x + m - 1) // m * m


def _mxu_tile():
    # v5e MXU is 4x128x128 -> 128-wide output tiles; v6e/v7x are 2x256x256.
    try:
        kind = jax.devices()[0].device_kind.lower()
    except Exception:
        kind = ""
    if "v5 lite" in kind or "v5e" in kind or "v5litepod" in kind:
        return 128
    return 256


_TILE = _mxu_tile()


# ----------------------------------------------------------------------------
# Pallas kernel 1: tiled GEMM (the conv hot path via im2col), bf16 -> f32 acc
# ----------------------------------------------------------------------------
def _matmul_kernel(a_ref, b_ref, o_ref, acc_ref):
    @pl.when(pl.program_id(2) == 0)
    def _():
        acc_ref[...] = jnp.zeros_like(acc_ref)

    acc_ref[...] += jnp.dot(a_ref[...], b_ref[...],
                            preferred_element_type=jnp.float32)

    @pl.when(pl.program_id(2) == pl.num_programs(2) - 1)
    def _():
        o_ref[...] = acc_ref[...].astype(o_ref.dtype)


def _pick_tk(K):
    for tk in (512, 384, 256, 128):
        if K % tk == 0:
            return tk
    return min(512, _round_up(K, 128))


def pallas_matmul(a, b):
    """a[M,K] @ b[K,N] -> f32[M,N]; MXU is fed bf16, accumulation is f32."""
    M, K = a.shape
    K2, N = b.shape
    assert K == K2
    a = a.astype(jnp.bfloat16)
    b = b.astype(jnp.bfloat16)

    tm = _TILE if M >= _TILE else _round_up(M, 8)
    tn = _TILE if N >= _TILE else 128
    tk = _pick_tk(K)
    Mp, Kp, Np = _round_up(M, tm), _round_up(K, tk), _round_up(N, tn)
    if (Mp, Kp) != (M, K):
        a = jnp.pad(a, ((0, Mp - M), (0, Kp - K)))
    if (Kp, Np) != (K, N):
        b = jnp.pad(b, ((0, Kp - K), (0, Np - N)))

    out = pl.pallas_call(
        _matmul_kernel,
        out_shape=jax.ShapeDtypeStruct((Mp, Np), jnp.float32),
        grid_spec=pltpu.PrefetchScalarGridSpec(
            num_scalar_prefetch=0,
            grid=(Mp // tm, Np // tn, Kp // tk),
            in_specs=[
                pl.BlockSpec((tm, tk), lambda i, j, k: (i, k)),
                pl.BlockSpec((tk, tn), lambda i, j, k: (k, j)),
            ],
            out_specs=pl.BlockSpec((tm, tn), lambda i, j, k: (i, j)),
            scratch_shapes=[pltpu.VMEM((tm, tn), jnp.float32)],
        ),
        compiler_params=pltpu.CompilerParams(
            dimension_semantics=("parallel", "parallel", "arbitrary")),
    )(a, b)
    if (Mp, Np) != (M, N):
        out = out[:M, :N]
    return out


# ----------------------------------------------------------------------------
# Pallas kernel 2: per-channel sum / sum-of-squares (BatchNorm batch stats)
# ----------------------------------------------------------------------------
def _bn_stats_kernel(x_ref, stat_ref):
    @pl.when(pl.program_id(0) == 0)
    def _():
        stat_ref[...] = jnp.zeros_like(stat_ref)

    x = x_ref[...]
    stat_ref[...] += jnp.concatenate(
        [jnp.sum(x, axis=0, keepdims=True),
         jnp.sum(x * x, axis=0, keepdims=True)], axis=0)


# ----------------------------------------------------------------------------
# Pallas kernel 3: fused normalize + affine + activation (+ dropout / tanh)
# ----------------------------------------------------------------------------
def _bn_act_kernel(x_ref, scale_ref, shift_ref, o_ref, *, mode):
    y = x_ref[...] * scale_ref[...] + shift_ref[...]
    if mode == "lrelu":
        y = jnp.where(y >= 0, y, 0.2 * y)
    else:  # "relu", "relu_tanh"
        y = jnp.maximum(y, 0.0)
    if mode == "relu_tanh":
        y = jnp.tanh(y)
    o_ref[...] = y


def _bn_act_drop_kernel(x_ref, scale_ref, shift_ref, mask_ref, o_ref):
    y = jnp.maximum(x_ref[...] * scale_ref[...] + shift_ref[...], 0.0)
    o_ref[...] = y * mask_ref[...]     # mask holds 0.0 / 2.0 (p = 0.5)


def _pick_tr(P, Cp):
    # Memory-bound stream: ~2 MiB f32 per block keeps double-buffered in+out
    # under v5e's 16 MiB scoped default and well inside v7x's 64 MiB VMEM,
    # while reaching the ~85% HBM-roofline regime (512+ rows).
    budget = max(8, (2 << 20) // (Cp * 4))
    tr = min(2048, budget, _round_up(P, 8))
    return max(8, (tr // 8) * 8)


def batchnorm_act(x_nhwc, gamma, beta, eps, mode, rng_key=None):
    N, H, W, C = x_nhwc.shape
    P = N * H * W
    Cp = _round_up(C, 128)
    tr = _pick_tr(P, Cp)
    Pp = _round_up(P, tr)

    x2 = x_nhwc.reshape(P, C)
    if (Pp, Cp) != (P, C):
        x2 = jnp.pad(x2, ((0, Pp - P), (0, Cp - C)))

    stats = pl.pallas_call(
        _bn_stats_kernel,
        out_shape=jax.ShapeDtypeStruct((2, Cp), jnp.float32),
        grid_spec=pltpu.PrefetchScalarGridSpec(
            num_scalar_prefetch=0,
            grid=(Pp // tr,),
            in_specs=[pl.BlockSpec((tr, Cp), lambda i: (i, 0))],
            out_specs=pl.BlockSpec((2, Cp), lambda i: (0, 0)),
        ),
        compiler_params=pltpu.CompilerParams(
            dimension_semantics=("arbitrary",)),
    )(x2)

    # tiny per-channel glue (O(C)): fold batch stats + affine into scale/shift
    mean = stats[0] / float(P)
    var = jnp.maximum(stats[1] / float(P) - mean * mean, 0.0)
    gamma_p = jnp.pad(gamma, (0, Cp - C)) if Cp != C else gamma
    beta_p = jnp.pad(beta, (0, Cp - C)) if Cp != C else beta
    scale = gamma_p / jnp.sqrt(var + eps)
    shift = beta_p - mean * scale

    if mode == "relu_drop":
        # TODO(synk): dropout randomness is generated with jax.random outside
        # the kernel (pltpu.prng_* does not lower in interpret mode); the
        # layers it touches are <=8x8x1024, so the extra traffic is negligible.
        keep = jax.random.bernoulli(rng_key, 0.5, (Pp, Cp))
        mask = jnp.where(keep, 2.0, 0.0).astype(jnp.float32)
        kernel = _bn_act_drop_kernel
        extra_in = [mask]
        extra_specs = [pl.BlockSpec((tr, Cp), lambda i: (i, 0))]
    else:
        kernel = functools.partial(_bn_act_kernel, mode=mode)
        extra_in = []
        extra_specs = []

    out = pl.pallas_call(
        kernel,
        out_shape=jax.ShapeDtypeStruct((Pp, Cp), jnp.float32),
        grid_spec=pltpu.PrefetchScalarGridSpec(
            num_scalar_prefetch=0,
            grid=(Pp // tr,),
            in_specs=[pl.BlockSpec((tr, Cp), lambda i: (i, 0)),
                      pl.BlockSpec((1, Cp), lambda i: (0, 0)),
                      pl.BlockSpec((1, Cp), lambda i: (0, 0))] + extra_specs,
            out_specs=pl.BlockSpec((tr, Cp), lambda i: (i, 0)),
        ),
        compiler_params=pltpu.CompilerParams(
            dimension_semantics=("parallel",)),
    )(x2, scale.reshape(1, Cp), shift.reshape(1, Cp), *extra_in)

    if (Pp, Cp) != (P, C):
        out = out[:P, :C]
    return out.reshape(N, H, W, C)


# ----------------------------------------------------------------------------
# Conv (im2col) and ConvTranspose (sub-pixel decomposition) + Pallas GEMM
# ----------------------------------------------------------------------------
def conv2d(x_nhwc, w_oihw, stride, pad):
    N, H, W, C = x_nhwc.shape
    Cout, Cin, kh, kw = w_oihw.shape
    assert C == Cin
    xb = x_nhwc.astype(jnp.bfloat16)
    xp = jnp.pad(xb, ((0, 0), (pad, pad), (pad, pad), (0, 0)))
    Ho = (H + 2 * pad - kh) // stride + 1
    Wo = (W + 2 * pad - kw) // stride + 1
    cols = []
    for i in range(kh):
        for j in range(kw):
            cols.append(xp[:, i:i + Ho * stride:stride,
                           j:j + Wo * stride:stride, :])
    patches = jnp.concatenate(cols, axis=-1).reshape(N * Ho * Wo, kh * kw * Cin)
    w2 = jnp.transpose(w_oihw, (2, 3, 1, 0)).reshape(kh * kw * Cin, Cout)
    out = pallas_matmul(patches, w2.astype(jnp.bfloat16))
    return out.reshape(N, Ho, Wo, Cout)


# ConvTranspose2d(k=4, stride=2, pad=1): out[2i+rh, 2j+rw] only ever sees the
# 2x2 input neighborhood with the tap tables below (offset into the 1-padded
# input along that axis, matching kernel-tap index), so each output parity is
# a stride-1 2x2 sub-convolution: 4x fewer MXU FLOPs and ~4x smaller patch
# matrices than convolving a zero-dilated input.
_SUBPIX_TAPS = {0: ((0, 3), (1, 1)),   # even output rows/cols
                1: ((1, 2), (2, 0))}   # odd output rows/cols


def conv_transpose2d(x_nhwc, w_iohw):
    N, H, W, C = x_nhwc.shape
    Cin, Cout, kh, kw = w_iohw.shape
    assert C == Cin and kh == 4 and kw == 4
    xb = x_nhwc.astype(jnp.bfloat16)
    xp = jnp.pad(xb, ((0, 0), (1, 1), (1, 1), (0, 0)))
    wb = w_iohw.astype(jnp.bfloat16)

    par = []
    for rh in (0, 1):
        row = []
        for rw in (0, 1):
            taps, wsub = [], []
            for (ro, ki) in _SUBPIX_TAPS[rh]:
                for (co, kj) in _SUBPIX_TAPS[rw]:
                    taps.append(xp[:, ro:ro + H, co:co + W, :])
                    wsub.append(wb[:, :, ki, kj])            # (Cin, Cout)
            patches = jnp.concatenate(taps, axis=-1).reshape(N * H * W, 4 * Cin)
            wmat = jnp.concatenate(wsub, axis=0)             # (4*Cin, Cout)
            o = pallas_matmul(patches, wmat).reshape(N, H, W, Cout)
            row.append(o)
        par.append(jnp.stack(row, axis=3))                   # (N,H,W,2,Cout)
    full = jnp.stack(par, axis=2)                            # (N,H,2,W,2,Cout)
    return full.reshape(N, 2 * H, 2 * W, Cout)


# ----------------------------------------------------------------------------
# Generator (pix2pix U-Net) forward
# ----------------------------------------------------------------------------
ENC = [(3, 64), (64, 128), (128, 256), (256, 512),
       (512, 512), (512, 512), (512, 512), (512, 512)]
DEC_IN = [512, 1536, 1536, 1536, 1536, 768, 384, 192]
DEC_OUT = [1024, 1024, 1024, 1024, 512, 256, 128, 3]


def make_params(key):
    params = {}
    keys = jax.random.split(key, 32)
    k = 0
    for i, (ci, co) in enumerate(ENC):
        params[f"enc{i}_w"] = 0.02 * jax.random.normal(
            keys[k], (co, ci, 4, 4), jnp.float32); k += 1
        params[f"enc{i}_g"] = jnp.ones((co,), jnp.float32)
        params[f"enc{i}_b"] = jnp.zeros((co,), jnp.float32)
    for i in range(8):
        params[f"dec{i}_w"] = 0.02 * jax.random.normal(
            keys[k], (DEC_IN[i], DEC_OUT[i], 4, 4), jnp.float32); k += 1
        params[f"dec{i}_g"] = jnp.ones((DEC_OUT[i],), jnp.float32)
        params[f"dec{i}_b"] = jnp.zeros((DEC_OUT[i],), jnp.float32)
    return params


def generator_forward(img_nchw, params, drop_key):
    x = jnp.transpose(img_nchw, (0, 2, 3, 1)).astype(jnp.float32)  # -> NHWC

    # ---- encoder: conv -> BN(eps=1e-10, batch stats) -> LeakyReLU(0.2)
    skips = []
    feat = x
    for i in range(8):
        feat = conv2d(feat, params[f"enc{i}_w"], stride=2, pad=1)
        feat = batchnorm_act(feat, params[f"enc{i}_g"], params[f"enc{i}_b"],
                             eps=1e-10, mode="lrelu")
        skips.append(feat)

    # ---- decoder: cat(skip) -> convT -> BN(eps=1e-5) -> ReLU (+dropout/tanh)
    drop_keys = jax.random.split(drop_key, 3)
    out = skips[7]
    for i in range(8):
        if i > 0:
            out = jnp.concatenate([out, skips[7 - i]], axis=-1)
        out = conv_transpose2d(out, params[f"dec{i}_w"])
        if i < 3:
            mode, key = "relu_drop", drop_keys[i]   # F.dropout(p=0.5)
        elif i == 7:
            mode, key = "relu_tanh", None           # final ReLU then Tanh
        else:
            mode, key = "relu", None
        out = batchnorm_act(out, params[f"dec{i}_g"], params[f"dec{i}_b"],
                            eps=1e-5, mode=mode, rng_key=key)

    return jnp.transpose(out, (0, 3, 1, 2))  # back to NCHW


if __name__ == "__main__":
    key = jax.random.PRNGKey(0)
    pkey, xkey, dkey = jax.random.split(key, 3)
    params = make_params(pkey)
    # 256 is the minimum spatial size for 8 stride-2 downsamples; batch kept
    # small (1) to stay light.
    img = jax.random.normal(xkey, (1, 3, 256, 256), jnp.float32)

    out = generator_forward(img, params, dkey)
    out = jax.block_until_ready(out)
    assert out.shape == (1, 3, 256, 256)
    assert bool(jnp.all(jnp.isfinite(out)))
    assert bool(jnp.all(jnp.abs(out) <= 1.0 + 1e-6))  # tanh range
    print("KERNEL_OK")
</pallas_src>

<mosaic_0001>
module attributes {stable_mosaic.version = 11 : i64} {
  func.func @_matmul_kernel(%arg0: i32, %arg1: i32, %arg2: i32, %arg3: memref<256x128xbf16, #tpu.memory_space<vmem>>, %arg4: memref<128x128xbf16, #tpu.memory_space<vmem>>, %arg5: memref<256x128xf32, #tpu.memory_space<vmem>>, %arg6: memref<256x128xf32, #tpu.memory_space<vmem>>) attributes {dimension_semantics = [#tpu.dimension_semantics<parallel>, #tpu.dimension_semantics<parallel>, #tpu.dimension_semantics<arbitrary>], iteration_bounds = array<i64: 64, 1, 1>, scalar_prefetch = 0 : i64, scratch_operands = 1 : i64, tpu.core_type = #tpu.core_type<tc>, window_params = [{transform_indices = @transform_0, window_bounds = array<i64: 256, 128>}, {transform_indices = @transform_1, window_bounds = array<i64: 128, 128>}, {transform_indices = @transform_2, window_bounds = array<i64: 256, 128>}]} {
    %c0_i32 = arith.constant 0 : i32
    %0 = arith.cmpi eq, %arg2, %c0_i32 : i32
    %1 = arith.extui %0 : i1 to i32
    %c0_i32_0 = arith.constant 0 : i32
    %2 = arith.cmpi ne, %1, %c0_i32_0 : i32
    scf.if %2 {
      %cst_10 = arith.constant 0.000000e+00 : f32
      %12 = vector.broadcast %cst_10 : f32 to vector<256x128xf32>
      %c0_11 = arith.constant 0 : index
      %c0_12 = arith.constant 0 : index
      %13 = vector.load %arg6[%c0_11, %c0_12] : memref<256x128xf32, #tpu.memory_space<vmem>>, vector<256x128xf32>
      tpu.vector_store %arg6[%c0_11, %c0_12], %12 {strides = array<i32>} : memref<256x128xf32, #tpu.memory_space<vmem>>, vector<256x128xf32>,
    } else {
    }
    %c0 = arith.constant 0 : index
    %c0_1 = arith.constant 0 : index
    %3 = vector.load %arg6[%c0, %c0_1] : memref<256x128xf32, #tpu.memory_space<vmem>>, vector<256x128xf32>
    %c0_2 = arith.constant 0 : index
    %c0_3 = arith.constant 0 : index
    %4 = vector.load %arg3[%c0_2, %c0_3] : memref<256x128xbf16, #tpu.memory_space<vmem>>, vector<256x128xbf16>
    %c0_4 = arith.constant 0 : index
    %c0_5 = arith.constant 0 : index
    %5 = vector.load %arg4[%c0_4, %c0_5] : memref<128x128xbf16, #tpu.memory_space<vmem>>, vector<128x128xbf16>
    %cst = arith.constant dense<0.000000e+00> : vector<256x128xf32>
    %6 = tpu.matmul %4, %5, %cst {dimension_numbers = #tpu.dot_dimension_numbers<[1], [0], [0], [1], [0, 0, 1, 1], [], []>} : vector<256x128xbf16>, vector<128x128xbf16>, vector<256x128xf32> -> vector<256x128xf32>
    %7 = arith.addf %3, %6 : vector<256x128xf32>
    %c0_6 = arith.constant 0 : index
    %c0_7 = arith.constant 0 : index
    %8 = vector.load %arg6[%c0_6, %c0_7] : memref<256x128xf32, #tpu.memory_space<vmem>>, vector<256x128xf32>
    tpu.vector_store %arg6[%c0_6, %c0_7], %7 {strides = array<i32>} : memref<256x128xf32, #tpu.memory_space<vmem>>, vector<256x128xf32>,
    %c0_i32_8 = arith.constant 0 : i32
    %9 = arith.cmpi eq, %arg2, %c0_i32_8 : i32
    %10 = arith.extui %9 : i1 to i32
    %c0_i32_9 = arith.constant 0 : i32
    %11 = arith.cmpi ne, %10, %c0_i32_9 : i32
    scf.if %11 {
      %c0_10 = arith.constant 0 : index
      %c0_11 = arith.constant 0 : index
      %12 = vector.load %arg6[%c0_10, %c0_11] : memref<256x128xf32, #tpu.memory_space<vmem>>, vector<256x128xf32>
      %c0_12 = arith.constant 0 : index
      %c0_13 = arith.constant 0 : index
      %13 = vector.load %arg5[%c0_12, %c0_13] : memref<256x128xf32, #tpu.memory_space<vmem>>, vector<256x128xf32>
      tpu.vector_store %arg5[%c0_12, %c0_13], %12 {strides = array<i32>} : memref<256x128xf32, #tpu.memory_space<vmem>>, vector<256x128xf32>,
    } else {
    }
    return
  }
  func.func @transform_0(%arg0: i32, %arg1: i32, %arg2: i32) -> (i32, i32) {
    %c0_i32 = arith.constant 0 : i32
    return %arg0, %arg2 : i32, i32
  }
  func.func @transform_1(%arg0: i32, %arg1: i32, %arg2: i32) -> (i32, i32) {
    %c0_i32 = arith.constant 0 : i32
    return %arg2, %arg1 : i32, i32
  }
  func.func @transform_2(%arg0: i32, %arg1: i32, %arg2: i32) -> (i32, i32) {
    %c0_i32 = arith.constant 0 : i32
    return %arg0, %arg1 : i32, i32
  }
}

</mosaic_0001>

<bundles_post_ra>
// kernel: tpu_custom_call.1
= control target key start
LH: loop header
LB: loop body
LE: loop exit
PB: predicated region body
PF: predicated region fallthrough
CT: control target
= control target key end

     0   :  { %7 = vsyncpa [#allocation4], 0  ;;  %s1433_s0 = inlined_call_operand.hbm [shape: bf16[16384,128], index: 0, kind: input, shape index: {}]   ;;  %s1434_s1 = inlined_call_operand.hbm [shape: bf16[128,128], index: 1, kind: input, shape index: {}]   ;;  %s1435_s2 = inlined_call_operand.hbm [shape: f32[16384,128], index: 2, kind: output, shape index: {}]  }
   0x1   :  { %9 = vsyncpa [#allocation4 + $0x1], 0 }
   0x2   :  { %10 = vsyncpa [#allocation7], 0 }
   0x3   :  { %11 = vsyncpa [#allocation5], 0 }
   0x4   :  { %13 = vsyncpa [#allocation5 + $0x1], 0  ;;  %s1226_s9 = smov 0   ;;  %s1228_s10 = smov 0  }
   0x5   :  { %s1230_s11 = smov 0   ;;  %s1232_s12 = smov 0  }
   0x6   :  { %s1234_s13 = smov 0   ;;  %s1236_s14 = smov 0  }
   0x7 LB: > { %s818_s15 = sadd.s32 4294967295, %s1204_s14   ;;  %s819_s16 = sadd.s32 4294967294, %s1204_s14   ;;  %s1204_s14 = sphi %s1236_s14, %s19_s14   ;;  %s1200_s13 = sphi %s1234_s13, %s1447_s13   ;;  %s1196_s12 = sphi %s1232_s12, %s1446_s12   ;;  %s1192_s11 = sphi %s1230_s11, %s1445_s11   ;;  %s1188_s10 = sphi %s1228_s10, %s1444_s10   ;;  %s1184_s9 = sphi %s1226_s9, %s1443_s9  }
   0x8   : > { %p60_p0 = scmp.ne.s32.totalorder %s1188_s10, %s1184_s9  ;;  %p1260_p1 = scmp.eq.s32.totalorder %s818_s15, 0 }
   0x9   : > { %p1264_p2 = scmp.eq.s32.totalorder %s818_s15, 63  ;;  %p120_p3 = scmp.eq.s32.totalorder %s819_s16, 63 }
   0xa   : > { %p1270_p4 = por %p1260_p1, %p60_p0  ;;  %p820_p5 = scmp.ge.s32.totalorder %s1204_s14, 1 }
   0xb   : > { %p1275_p6 = por %p120_p3, %p60_p0  ;;  %p127_p7 = scmp.lt.s32.totalorder %s1204_s14, 65 }
   0xc   : > { %s142_s23 = sshll.u32 %s1434_s1, 4  ;;  %s1206_s25 = smov [#allocation6]   ;;  %s143_s23 = int_to_ptr.hbm [resolvable:$true] %s142_s23 }
   0xd   : > { %p1283_p8 = pnand %p820_p5, %p127_p7  ;;  %s144_s26 = sshll.u32 %s1206_s25, 4  ;;  %s145_s26 = int_to_ptr.vmem [resolvable:$true] %s144_s26 }
   0xe   : > { %s1207_s27 = smov 64   ;;  %s1208_s28 = smov 4  }
   0xf   : > { %p989_p9 = pneg %p1283_p8  ;;  %s38_s29 = sadd.s32 1, %s1200_s13 }
  0x10   : > { %p40_p11 = scmp.ge.s32.totalorder %s38_s29, 64  ;;  %s47_s30 = sadd.s32 1, %s1192_s11 }
  0x11   : > { %p990_p10 = pnand %p989_p9, %p1260_p1  ;;  %p54_p12 = scmp.ne.s32.totalorder %s1192_s11, %s1188_s10 }
  0x12   : > { %p55_p13 = scmp.eq.s32.totalorder %s1204_s14, 0  ;;  %s1449_s29 = smov (%p40_p11, %s38_s29), 0 }
  0x13   : > { %992 = dma.hbm_to_vmem [thread:$0]  (!%p990_p10), %s143_s23, 1024, %s145_s26, [#allocation7], %s1207_s27, %s1207_s27, %s1208_s28  }
  0x14   : > { %p1301_p0 = por %p55_p13, %p54_p12  ;;  %p1307_p3 = por %p1264_p2, %p54_p12 }
  0x15   : > { %s42_s5 = ssub.s32 %s1200_s13, %s1449_s29  ;;  %p1002_p5 = scmp.lt.s32.totalorder %s1204_s14, 64 }
  0x16   : > { %p45_p7 = scmp.eq.s32.totalorder %s42_s5, 0  ;;  %s158_s6 = sand.u32 1, %s1192_s11  }
  0x17   : > { %s823_s7 = sshll.u32 %s158_s6, 7  ;;  %s931_s15 = sshll.u32 %s1200_s13, 7 }
  0x18   : > { %s1316_s8 = scalar_select %p45_p7, %s1192_s11, %s47_s30  }
  0x19   : > { %s168_s22 = scalar_lea.hbm %s1433_s0, %s931_s15  ;;  %s162_s23 = scalar_lea.vmem [#allocation3], %s823_s7 }
  0x1a   : > { %s171_s25 = sshll.u32 %s162_s23, 4  ;;  %s169_s18 = sshll.u32 %s168_s22, 4  ;;  %s172_s25 = int_to_ptr.vmem [resolvable:$true] %s171_s25  ;;  %s170_s18 = int_to_ptr.hbm [resolvable:$true] %s169_s18 }
  0x1b   : > { %p994_p2 = pnand %p1002_p5, %p1301_p0  ;;  %s159_s26 = scalar_lea.sflag [#allocation4], %s158_s6 }
  0x1c   : > { %183 = sbr.rel (%p1283_p8) target bundleno = 262 (0x106), region = 28  ;;  %s1330_s30 = sand.u32 (!%p1283_p8), 1, %s1188_s10  }
  0x1d   : > { %996 = dma.hbm_to_vmem [thread:$0]  (!%p994_p2), %s170_s18, 2048, %s172_s25, %s159_s26, %s1207_s27, %s1207_s27, %s1208_s28  }
  0x1e   : > { %s827_s5 = sshll.u32 (!%p1283_p8), %s1330_s30, 7  ;;  %s186_s7 = scalar_lea.sflag (!%p1283_p8), [#allocation4], %s1330_s30 }
  0x1f   : > { %s1334_s15 = scalar_lea.vmem (!%p1283_p8), [#allocation3], %s827_s5 }
  0x21   : > { %1171 = dma.done.wait (%p1270_p4), %s186_s7, 2048  }
  0x22   : > { %1173 = vsyncadd (%p1270_p4), %s186_s7, 4294965248 }
  0x23   : > { %1175 = dma.done.wait (%p1260_p1), [#allocation7], 1024  }
  0x24   : > { %1177 = vsyncadd (%p1260_p1), [#allocation7], 4294966272  ;;  %v955_v0 = vld [vmem:[#allocation6 + $0x38] sm:$0xff]  ;;  %v954_v1 = vld [vmem:[#allocation6 + $0x30] sm:$0xff]  ;;  %s829_s17 = sshll.u32 %s1330_s30, 8  ;;  %s956_s24 = sshll.u32 %s1196_s12, 8 }
  0x25   : > { %479 = vmatpush.bf16.msra.mxu0 %v955_v0  ;;  %957 = vmatpush.bf16.msra.mxu1 %v955_v0  ;;  %v953_v2 = vld [vmem:[#allocation6 + $0x28] sm:$0xff]  ;;  %v952_v3 = vld [vmem:[#allocation6 + $0x20] sm:$0xff]  ;;  %v951_v4 = vld [vmem:[#allocation6 + $0x18] sm:$0xff]  ;;  %s1361_s19 = scalar_lea.vmem [#allocation8], %s829_s17  ;;  %s712_s3 = scalar_lea.hbm %s1435_s2, %s956_s24 }
  0x26   : > { %958 = vmatpush.bf16.msra.mxu2 %v955_v0  ;;  %959 = vmatpush.bf16.msra.mxu3 %v955_v0  ;;  %v950_v5 = vld [vmem:[#allocation6 + $0x10] sm:$0xff]  ;;  %v949_v6 = vld [vmem:[#allocation6 + $0x8] sm:$0xff]  ;;  %v948_v7 = vld [vmem:[#allocation6] sm:$0xff]  ;;  %s713_s6 = sshll.u32 %s1361_s19, 4  ;;  %s715_s16 = sshll.u32 %s712_s3, 4  ;;  %s714_s6 = int_to_ptr.vmem [resolvable:$true] %s713_s6  ;;  %s716_s16 = int_to_ptr.hbm [resolvable:$true] %s715_s16 }
  0x27   : > { %v932_v8 = vld [vmem:[%s1334_s15] sm:$0xff]  ;;  %v933_v12 = vld [vmem:[%s1334_s15 + $0x8] sm:$0xff]  ;;  %v934_v16 = vld [vmem:[%s1334_s15 + $0x10] sm:$0xff]  ;;  %s700_s12 = scalar_lea.sflag [#allocation5], %s1330_s30  ;;  %s1132_s21 = sshra.s32 %s716_s16, 4  ;;  %s1133_s21 = int_to_ptr.hbm [resolvable:$true] %s1132_s21 }
  0x28   : > { %v936_v9 = vld [vmem:[%s1334_s15 + $0x20] sm:$0xff]  ;;  %v937_v13 = vld [vmem:[%s1334_s15 + $0x28] sm:$0xff]  ;;  %v938_v17 = vld [vmem:[%s1334_s15 + $0x30] sm:$0xff]  ;;  %s1134_s22 = scalar_lea.hbm %s1133_s21, 256  ;;  %s1138_s18 = scalar_lea.hbm %s1435_s2, 16384 }
  0x29   : > { %480 = vmatpush.bf16.msra.mxu0 %v954_v1  ;;  %960 = vmatpush.bf16.msra.mxu1 %v954_v1  ;;  %v940_v10 = vld [vmem:[%s1334_s15 + $0x40] sm:$0xff]  ;;  %v941_v14 = vld [vmem:[%s1334_s15 + $0x48] sm:$0xff]  ;;  %v942_v18 = vld [vmem:[%s1334_s15 + $0x50] sm:$0xff]  ;;  %p1135_p1 = scmp.ne.s32.totalorder %s1133_s21, %s1134_s22  ;;  %p1139_p9 = scmp.lt.s32.totalorder %s1133_s21, %s1435_s2 }
  0x2a   : > { %961 = vmatpush.bf16.msra.mxu2 %v954_v1  ;;  %962 = vmatpush.bf16.msra.mxu3 %v954_v1  ;;  %v944_v11 = vld [vmem:[%s1334_s15 + $0x60] sm:$0xff]  ;;  %v945_v15 = vld [vmem:[%s1334_s15 + $0x68] sm:$0xff]  ;;  %v946_v19 = vld [vmem:[%s1334_s15 + $0x70] sm:$0xff]  ;;  %p1140_p10 = scmp.lt.s32.totalorder %s1138_s18, %s1134_s22 }
  0x2b   : > { %v935_v20 = vld [vmem:[%s1334_s15 + $0x18] sm:$0xff]  ;;  %p1136_p4 = pnand %p1135_p1, %p1307_p3 }
  0x2c   : > { %v939_v21 = vld [vmem:[%s1334_s15 + $0x38] sm:$0xff]  ;;  %p1141_p11 = por %p1140_p10, %p1139_p9 }
  0x2d   : > { %481 = vmatpush.bf16.msra.mxu0 %v953_v2  ;;  %963 = vmatpush.bf16.msra.mxu1 %v953_v2  ;;  %v943_v22 = vld [vmem:[%s1334_s15 + $0x58] sm:$0xff]  ;;  %p1137_p8 = pneg %p1136_p4 }
  0x2e   : > { %964 = vmatpush.bf16.msra.mxu2 %v953_v2  ;;  %965 = vmatpush.bf16.msra.mxu3 %v953_v2  ;;  %v947_v23 = vld [vmem:[%s1334_s15 + $0x78] sm:$0xff] }
  0x2f   : > { %p1142_p12 = pnand %p1141_p11, %p1137_p8 }
  0x31   : > { %482 = vmatpush.bf16.msra.mxu0 %v952_v3  ;;  %966 = vmatpush.bf16.msra.mxu1 %v952_v3 }
  0x32   : > { %967 = vmatpush.bf16.msra.mxu2 %v952_v3  ;;  %968 = vmatpush.bf16.msra.mxu3 %v952_v3 }
  0x35   : > { %483 = vmatpush.bf16.msra.mxu0 %v951_v4  ;;  %969 = vmatpush.bf16.msra.mxu1 %v951_v4 }
  0x36   : > { %970 = vmatpush.bf16.msra.mxu2 %v951_v4  ;;  %971 = vmatpush.bf16.msra.mxu3 %v951_v4 }
  0x39   : > { %484 = vmatpush.bf16.msra.mxu0 %v950_v5  ;;  %972 = vmatpush.bf16.msra.mxu1 %v950_v5 }
  0x3a   : > { %973 = vmatpush.bf16.msra.mxu2 %v950_v5  ;;  %974 = vmatpush.bf16.msra.mxu3 %v950_v5 }
  0x3d   : > { %485 = vmatpush.bf16.msra.mxu0 %v949_v6  ;;  %975 = vmatpush.bf16.msra.mxu1 %v949_v6 }
  0x3e   : > { %976 = vmatpush.bf16.msra.mxu2 %v949_v6  ;;  %977 = vmatpush.bf16.msra.mxu3 %v949_v6 }
  0x41   : > { %486 = vmatpush.bf16.msra.mxu0 %v948_v7  ;;  %978 = vmatpush.bf16.msra.mxu1 %v948_v7 }
  0x42   : > { %979 = vmatpush.bf16.msra.mxu2 %v948_v7  ;;  %980 = vmatpush.bf16.msra.mxu3 %v948_v7 }
  0x44   : > { %487 = vmatmul.bf16.vlgmr.msra.gmra.mxu0 %v932_v8  ;;  %507 = vmatmul.bf16.vlgmr.msra.gmra.mxu1 %v936_v9 }
  0x45   : > { %527 = vmatmul.bf16.vlgmr.msra.gmra.mxu2 %v940_v10  ;;  %547 = vmatmul.bf16.vlgmr.msra.gmra.mxu3 %v944_v11 }
  0x54   : > { %492 = vmatmul.bf16.gmra.mxu0 %v933_v12  ;;  %512 = vmatmul.bf16.gmra.mxu1 %v937_v13 }
  0x55   : > { %532 = vmatmul.bf16.gmra.mxu2 %v941_v14  ;;  %552 = vmatmul.bf16.gmra.mxu3 %v945_v15 }
  0x64   : > { %497 = vmatmul.bf16.gmra.mxu0 %v934_v16  ;;  %517 = vmatmul.bf16.gmra.mxu1 %v938_v17 }
  0x65   : > { %537 = vmatmul.bf16.gmra.mxu2 %v942_v18  ;;  %557 = vmatmul.bf16.gmra.mxu3 %v946_v19 }
  0x74   : > { %502 = vmatmul.bf16.gmra.mxu0 %v935_v20  ;;  %522 = vmatmul.bf16.gmra.mxu1 %v939_v21 }
  0x75   : > { %542 = vmatmul.bf16.gmra.mxu2 %v943_v22  ;;  %562 = vmatmul.bf16.gmra.mxu3 %v947_v23 }
  0xc1   : > { %v488_v24 = vpop.f32.mrf.mxu0  ;;  %v508_v25 = vpop.f32.mrf.mxu1 }
  0xc2   : > { %667 = vst [vmem:[%s1361_s19] sm:$0xff] %v488_v24 }
  0xc3   : > { %675 = vst [vmem:[%s1361_s19 + $0x40] sm:$0xff] %v508_v25 }
  0xc8   : > { %v528_v26 = vpop.f32.mrf.mxu2  ;;  %v548_v27 = vpop.f32.mrf.mxu3 }
  0xc9   : > { %683 = vst [vmem:[%s1361_s19 + $0x80] sm:$0xff] %v528_v26  ;;  %v490_v28 = vpop.f32.mrf.mxu0  ;;  %v510_v29 = vpop.f32.mrf.mxu1 }
  0xca   : > { %691 = vst [vmem:[%s1361_s19 + $0xc0] sm:$0xff] %v548_v27 }
  0xcb   : > { %668 = vst [vmem:[%s1361_s19 + $0x8] sm:$0xff] %v490_v28 }
  0xcc   : > { %676 = vst [vmem:[%s1361_s19 + $0x48] sm:$0xff] %v510_v29 }
  0xd0   : > { %v530_v30 = vpop.f32.mrf.mxu2  ;;  %v550_v31 = vpop.f32.mrf.mxu3 }
  0xd1   : > { %684 = vst [vmem:[%s1361_s19 + $0x88] sm:$0xff] %v530_v30  ;;  %v493_v32 = vpop.f32.mrf.mxu0  ;;  %v513_v33 = vpop.f32.mrf.mxu1 }
  0xd2   : > { %692 = vst [vmem:[%s1361_s19 + $0xc8] sm:$0xff] %v550_v31 }
  0xd3   : > { %669 = vst [vmem:[%s1361_s19 + $0x10] sm:$0xff] %v493_v32 }
  0xd4   : > { %677 = vst [vmem:[%s1361_s19 + $0x50] sm:$0xff] %v513_v33 }
  0xd8   : > { %v533_v34 = vpop.f32.mrf.mxu2  ;;  %v553_v35 = vpop.f32.mrf.mxu3 }
  0xd9   : > { %685 = vst [vmem:[%s1361_s19 + $0x90] sm:$0xff] %v533_v34  ;;  %v495_v36 = vpop.f32.mrf.mxu0  ;;  %v515_v37 = vpop.f32.mrf.mxu1 }
  0xda   : > { %693 = vst [vmem:[%s1361_s19 + $0xd0] sm:$0xff] %v553_v35 }
  0xdb   : > { %670 = vst [vmem:[%s1361_s19 + $0x18] sm:$0xff] %v495_v36 }
  0xdc   : > { %678 = vst [vmem:[%s1361_s19 + $0x58] sm:$0xff] %v515_v37 }
  0xe0   : > { %v535_v38 = vpop.f32.mrf.mxu2  ;;  %v555_v39 = vpop.f32.mrf.mxu3 }
  0xe1   : > { %686 = vst [vmem:[%s1361_s19 + $0x98] sm:$0xff] %v535_v38  ;;  %v498_v40 = vpop.f32.mrf.mxu0  ;;  %v518_v41 = vpop.f32.mrf.mxu1 }
  0xe2   : > { %694 = vst [vmem:[%s1361_s19 + $0xd8] sm:$0xff] %v555_v39 }
  0xe3   : > { %671 = vst [vmem:[%s1361_s19 + $0x20] sm:$0xff] %v498_v40 }
  0xe4   : > { %679 = vst [vmem:[%s1361_s19 + $0x60] sm:$0xff] %v518_v41 }
  0xe8   : > { %v538_v42 = vpop.f32.mrf.mxu2  ;;  %v558_v43 = vpop.f32.mrf.mxu3 }
  0xe9   : > { %687 = vst [vmem:[%s1361_s19 + $0xa0] sm:$0xff] %v538_v42  ;;  %v500_v44 = vpop.f32.mrf.mxu0  ;;  %v520_v45 = vpop.f32.mrf.mxu1 }
  0xea   : > { %695 = vst [vmem:[%s1361_s19 + $0xe0] sm:$0xff] %v558_v43 }
  0xeb   : > { %672 = vst [vmem:[%s1361_s19 + $0x28] sm:$0xff] %v500_v44 }
  0xec   : > { %680 = vst [vmem:[%s1361_s19 + $0x68] sm:$0xff] %v520_v45 }
  0xf0   : > { %v540_v46 = vpop.f32.mrf.mxu2  ;;  %v560_v47 = vpop.f32.mrf.mxu3 }
  0xf1   : > { %688 = vst [vmem:[%s1361_s19 + $0xa8] sm:$0xff] %v540_v46  ;;  %v503_v48 = vpop.f32.mrf.mxu0  ;;  %v523_v49 = vpop.f32.mrf.mxu1 }
  0xf2   : > { %696 = vst [vmem:[%s1361_s19 + $0xe8] sm:$0xff] %v560_v47 }
  0xf3   : > { %673 = vst [vmem:[%s1361_s19 + $0x30] sm:$0xff] %v503_v48 }
  0xf4   : > { %681 = vst [vmem:[%s1361_s19 + $0x70] sm:$0xff] %v523_v49 }
  0xf8   : > { %v543_v50 = vpop.f32.mrf.mxu2  ;;  %v563_v51 = vpop.f32.mrf.mxu3 }
  0xf9   : > { %689 = vst [vmem:[%s1361_s19 + $0xb0] sm:$0xff] %v543_v50  ;;  %v505_v52 = vpop.f32.mrf.mxu0  ;;  %v525_v53 = vpop.f32.mrf.mxu1 }
  0xfa   : > { %697 = vst [vmem:[%s1361_s19 + $0xf0] sm:$0xff] %v563_v51 }
  0xfb   : > { %674 = vst [vmem:[%s1361_s19 + $0x38] sm:$0xff] %v505_v52 }
  0xfc   : > { %682 = vst [vmem:[%s1361_s19 + $0x78] sm:$0xff] %v525_v53 }
 0x100   : > { %v545_v54 = vpop.f32.mrf.mxu2  ;;  %v565_v55 = vpop.f32.mrf.mxu3 }
 0x101   : > { %690 = vst [vmem:[%s1361_s19 + $0xb8] sm:$0xff] %v545_v54 }
 0x102   : > { %698 = vst [vmem:[%s1361_s19 + $0xf8] sm:$0xff] %v565_v55 }
 0x103   : > { %1145 = shalt.err (!%p1142_p12)
}
 0x104   : > { %s1209_s30 = smov 128   ;;  %s1210_s7 = smov 8  }
 0x105   : > { %987 = dma.vmem_to_hbm [thread:$0]  (%p1307_p3), %s714_s6, 4096, %s716_s16, %s700_s12, %s1209_s30, %s1209_s30, %s1210_s7  }
 0x106 PF: > { %p1004_p13 = scmp.ge.s32.totalorder %s1204_s14, 2  ;;  %s730_s15 = sand.u32 1, %s1184_s9  }
 0x107   : > { %s731_s17 = scalar_lea.sflag [#allocation5], %s730_s15 }
 0x108   : > { %p998_p0 = pnand %p1004_p13, %p1275_p6 }
 0x10a   : > { %p999_p5 = pneg %p998_p0 }
 0x10c   : > { %1179 = dma.done.wait (%p999_p5), %s731_s17, 4096  }
 0x10d   : > { %1181 = vsyncadd (%p999_p5), %s731_s17, 4294963200  ;;  %s19_s14 = sadd.s32 1, %s1204_s14   ;;  %s1443_s9 = smov %s1188_s10 }
 0x10e   : > { %p16_p7 = scmp.ge.s32.totalorder %s19_s14, 66   ;;  %s1444_s10 = smov %s1192_s11 }
 0x10f   : > { %s1445_s11 = smov %s1316_s8  ;;  %s1446_s12 = smov %s1200_s13 }
 0x110   : > { %s1447_s13 = smov %s1449_s29  ;;  %18 = sbr.rel (!%p16_p7) target bundleno = 7 (0x7), region = 86 }
 0x115   :  { %737 = vsyncpa [#allocation4], 1 }
 0x116   :  { %739 = vsyncpa [#allocation4 + $0x1], 1 }
 0x117   :  { %740 = vsyncpa [#allocation7], 1 }
 0x118   :  { %741 = vsyncpa [#allocation5], 1 }
 0x119   :  { %743 = vsyncpa [#allocation5 + $0x1], 1 }

</bundles_post_ra>
